<compile_context>
chip_gen: v5e
topology: v5e:2x2
jax: 0.10.0
libtpu: 0.0.40
codegen_flags: <defaults>
</compile_context>

<pallas_src>
import math
import functools

import jax
import jax.numpy as jnp
from jax import lax
from jax.experimental import pallas as pl
from jax.experimental.pallas import tpu as pltpu


def _fused_attn_kernel(x_ref, wqkv_ref, bqkv_ref, wp_ref, bp_ref, o_ref, y_ref,
                       *, n_head, seq_len, batch_block):
    """One grid step = `batch_block` batch elements, fully fused attention."""
    C = x_ref.shape[-1]
    hd = C // n_head
    scale = 1.0 / math.sqrt(hd)

    # Fused QKV projection over the whole batch block: one MXU matmul with
    # M = batch_block*T and N = 3C.
    x = x_ref[...]                                                # (bt*T, C)
    qkv = jnp.dot(x, wqkv_ref[...],
                  preferred_element_type=jnp.float32) + bqkv_ref[...]  # (bt*T, 3C)

    # Per (batch element, head) attention on static contiguous slices of the
    # fused projection. No reshape/transpose of the head axis; the QK^T
    # contraction is expressed directly via dot_general.
    for b in range(batch_block):
        r0 = b * seq_len
        for h in range(n_head):
            c0 = h * hd
            q = qkv[r0:r0 + seq_len, c0:c0 + hd] * scale           # (T, hd)
            k = qkv[r0:r0 + seq_len, C + c0:C + c0 + hd]           # (T, hd)
            v = qkv[r0:r0 + seq_len, 2 * C + c0:2 * C + c0 + hd]   # (T, hd)

            # att = (q * 1/sqrt(hd)) @ k^T : contract the head dim of both
            # operands (no transposed k materialized).
            att = lax.dot_general(q, k, (((1,), (1,)), ((), ())),
                                  preferred_element_type=jnp.float32)  # (T, T)

            # Softmax over keys (unmasked -- matches the reference forward).
            att = jnp.exp(att - jnp.max(att, axis=-1, keepdims=True))
            inv = pl.reciprocal(jnp.sum(att, axis=-1, keepdims=True))  # (T, 1)
            att = att * inv
            # attn_drop / resid_drop: identity in eval mode.

            # Write this head's output into its column slice of the (bt*T, C)
            # accumulator -> avoids the (nh, T, hd) -> (T, C) transpose.
            y_ref[r0:r0 + seq_len, c0:c0 + hd] = jnp.dot(
                att, v, preferred_element_type=jnp.float32)

    # Output projection: one matmul over the whole batch block.
    out = jnp.dot(y_ref[...], wp_ref[...],
                  preferred_element_type=jnp.float32) + bp_ref[...]
    o_ref[...] = out.astype(o_ref.dtype)


def causal_self_attention(x, params, n_head, *, batch_block=None):
    """x: (B, T, C) float32. params: dict of (in, out) weights and biases.

    batch_block: batch elements per grid step. Defaults to the whole batch
    (single grid step; best on single-TensorCore v5e/v6e). Pass e.g. B // 2 on
    v7x to expose a parallel grid axis for its two TensorCores.
    """
    B, T, C = x.shape
    if batch_block is None:
        batch_block = B
    assert B % batch_block == 0, "batch_block must divide B"
    grid = (B // batch_block,)

    # Fuse Q/K/V weights into a single (C, 3C) matrix (and (1, 3C) bias).
    # In a real model this fusion happens once at parameter-load time.
    wqkv = jnp.concatenate([params["wq"], params["wk"], params["wv"]], axis=1)
    bqkv = jnp.concatenate(
        [params["bq"], params["bk"], params["bv"]]).reshape(1, 3 * C)
    wp = params["wp"]
    bp = params["bp"].reshape(1, C)

    # Flatten (B, T, C) -> (B*T, C) in the wrapper (contiguous, free) so the
    # kernel refs are already the 2-D tiles the MXU wants.
    xf = x.reshape(B * T, C)
    rows = batch_block * T

    kernel = functools.partial(_fused_attn_kernel, n_head=n_head, seq_len=T,
                               batch_block=batch_block)

    # TODO(synk): for realistic GPT shapes (T>=512) the (T,T) attention tile
    # must be tiled along the key axis with online softmax (flash pattern);
    # at T=8 the full tile fits trivially in VMEM so it is kept whole here.
    out = pl.pallas_call(
        kernel,
        out_shape=jax.ShapeDtypeStruct((B * T, C), x.dtype),
        grid=grid,
        in_specs=[
            pl.BlockSpec((rows, C), lambda i: (i, 0)),       # x (batch block)
            pl.BlockSpec((C, 3 * C), lambda i: (0, 0)),      # fused QKV weight
            pl.BlockSpec((1, 3 * C), lambda i: (0, 0)),      # fused QKV bias
            pl.BlockSpec((C, C), lambda i: (0, 0)),          # output proj weight
            pl.BlockSpec((1, C), lambda i: (0, 0)),          # output proj bias
        ],
        out_specs=pl.BlockSpec((rows, C), lambda i: (i, 0)),
        scratch_shapes=[pltpu.VMEM((rows, C), jnp.float32)],  # per-head y accum
        compiler_params=pltpu.CompilerParams(
            dimension_semantics=("parallel",)),
    )(xf, wqkv, bqkv, wp, bp)

    return out.reshape(B, T, C)


def _reference(x, params, n_head):
    """Plain-JAX reference mirroring the PyTorch forward (eval mode)."""
    B, T, C = x.shape
    hd = C // n_head
    q = x @ params["wq"] + params["bq"]
    k = x @ params["wk"] + params["bk"]
    v = x @ params["wv"] + params["bv"]
    q = q.reshape(B, T, n_head, hd).transpose(0, 2, 1, 3)
    k = k.reshape(B, T, n_head, hd).transpose(0, 2, 1, 3)
    v = v.reshape(B, T, n_head, hd).transpose(0, 2, 1, 3)
    att = jnp.einsum('bhtd,bhsd->bhts', q, k) * (1.0 / math.sqrt(hd))
    att = jax.nn.softmax(att, axis=-1)
    y = jnp.einsum('bhts,bhsd->bhtd', att, v)
    y = y.transpose(0, 2, 1, 3).reshape(B, T, C)
    return y @ params["wp"] + params["bp"]


if __name__ == "__main__":
    # Small shapes consistent with the module: T <= block_size, C % n_head == 0.
    B, T, C, n_head = 2, 8, 32, 4

    key = jax.random.PRNGKey(0)
    keys = jax.random.split(key, 9)

    # Deterministic parameter init (weights stored as (in, out), i.e. W^T of
    # the PyTorch nn.Linear weight).
    scale = 1.0 / math.sqrt(C)
    params = {
        "wq": jax.random.uniform(keys[0], (C, C), jnp.float32, -scale, scale),
        "bq": jax.random.uniform(keys[1], (C,), jnp.float32, -scale, scale),
        "wk": jax.random.uniform(keys[2], (C, C), jnp.float32, -scale, scale),
        "bk": jax.random.uniform(keys[3], (C,), jnp.float32, -scale, scale),
        "wv": jax.random.uniform(keys[4], (C, C), jnp.float32, -scale, scale),
        "bv": jax.random.uniform(keys[5], (C,), jnp.float32, -scale, scale),
        "wp": jax.random.uniform(keys[6], (C, C), jnp.float32, -scale, scale),
        "bp": jax.random.uniform(keys[7], (C,), jnp.float32, -scale, scale),
    }
    x = jax.random.normal(keys[8], (B, T, C), jnp.float32)

    out = causal_self_attention(x, params, n_head)
    out = jax.block_until_ready(out)

    ref = _reference(x, params, n_head)
    assert out.shape == (B, T, C)
    assert jnp.allclose(out, ref, atol=1e-4, rtol=1e-4), "mismatch vs reference"

    print("KERNEL_OK")
</pallas_src>

<mosaic_0001>
module attributes {stable_mosaic.version = 11 : i64} {
  func.func @_fused_attn_kernel(%arg0: i32, %arg1: memref<16x32xf32, #tpu.memory_space<vmem>>, %arg2: memref<32x96xf32, #tpu.memory_space<vmem>>, %arg3: memref<1x96xf32, #tpu.memory_space<vmem>>, %arg4: memref<32x32xf32, #tpu.memory_space<vmem>>, %arg5: memref<1x32xf32, #tpu.memory_space<vmem>>, %arg6: memref<16x32xf32, #tpu.memory_space<vmem>>, %arg7: memref<16x32xf32, #tpu.memory_space<vmem>>) attributes {dimension_semantics = [#tpu.dimension_semantics<parallel>], iteration_bounds = array<i64: 1>, scalar_prefetch = 0 : i64, scratch_operands = 1 : i64, tpu.core_type = #tpu.core_type<tc>, window_params = [{transform_indices = @transform_0, window_bounds = array<i64: 16, 32>}, {pipeline_mode = #tpu.pipeline_mode<synchronous>, transform_indices = @transform_1, window_bounds = array<i64: 32, 96>}, {pipeline_mode = #tpu.pipeline_mode<synchronous>, transform_indices = @transform_2, window_bounds = array<i64: 1, 96>}, {pipeline_mode = #tpu.pipeline_mode<synchronous>, transform_indices = @transform_3, window_bounds = array<i64: 32, 32>}, {pipeline_mode = #tpu.pipeline_mode<synchronous>, transform_indices = @transform_4, window_bounds = array<i64: 1, 32>}, {transform_indices = @transform_5, window_bounds = array<i64: 16, 32>}]} {
    %c0 = arith.constant 0 : index
    %c0_0 = arith.constant 0 : index
    %0 = vector.load %arg1[%c0, %c0_0] : memref<16x32xf32, #tpu.memory_space<vmem>>, vector<16x32xf32>
    %c0_1 = arith.constant 0 : index
    %c0_2 = arith.constant 0 : index
    %1 = vector.load %arg2[%c0_1, %c0_2] : memref<32x96xf32, #tpu.memory_space<vmem>>, vector<32x96xf32>
    %cst = arith.constant dense<0.000000e+00> : vector<16x96xf32>
    %2 = tpu.matmul %0, %1, %cst {dimension_numbers = #tpu.dot_dimension_numbers<[1], [0], [0], [1], [0, 0, 1, 1], [], []>} : vector<16x32xf32>, vector<32x96xf32>, vector<16x96xf32> -> vector<16x96xf32>
    %c0_3 = arith.constant 0 : index
    %c0_4 = arith.constant 0 : index
    %3 = vector.load %arg3[%c0_3, %c0_4] : memref<1x96xf32, #tpu.memory_space<vmem>>, vector<1x96xf32>
    %4 = vector.broadcast %3 : vector<1x96xf32> to vector<16x96xf32>
    %5 = arith.addf %2, %4 : vector<16x96xf32>
    %6 = vector.extract_strided_slice %5 {offsets = [0, 0], sizes = [8, 8], strides = [1, 1]} : vector<16x96xf32> to vector<8x8xf32>
    %cst_5 = arith.constant 0.353553385 : f32
    %7 = vector.broadcast %cst_5 : f32 to vector<8x8xf32>
    %8 = arith.mulf %6, %7 : vector<8x8xf32>
    %9 = vector.extract_strided_slice %5 {offsets = [0, 32], sizes = [8, 8], strides = [1, 1]} : vector<16x96xf32> to vector<8x8xf32>
    %10 = vector.extract_strided_slice %5 {offsets = [0, 64], sizes = [8, 8], strides = [1, 1]} : vector<16x96xf32> to vector<8x8xf32>
    %cst_6 = arith.constant dense<0.000000e+00> : vector<8x8xf32>
    %11 = tpu.matmul %8, %9, %cst_6 {dimension_numbers = #tpu.dot_dimension_numbers<[1], [1], [0], [0], [0, 0, 1, 0], [], []>} : vector<8x8xf32>, vector<8x8xf32>, vector<8x8xf32> -> vector<8x8xf32>
    %cst_7 = arith.constant dense<0xFF800000> : vector<8xf32>
    %12 = vector.multi_reduction <maximumf>, %11, %cst_7 [1] : vector<8x8xf32> to vector<8xf32>
    %13 = vector.shape_cast %12 : vector<8xf32> to vector<8x1xf32>
    %14 = vector.broadcast %13 : vector<8x1xf32> to vector<8x8xf32>
    %15 = arith.subf %11, %14 : vector<8x8xf32>
    %16 = math.exp %15 : vector<8x8xf32>
    %cst_8 = arith.constant dense<0.000000e+00> : vector<8xf32>
    %17 = vector.multi_reduction <add>, %16, %cst_8 [1] : vector<8x8xf32> to vector<8xf32>
    %18 = vector.shape_cast %17 : vector<8xf32> to vector<8x1xf32>
    %19 = tpu.reciprocal %18 : vector<8x1xf32> -> vector<8x1xf32>
    %20 = vector.broadcast %19 : vector<8x1xf32> to vector<8x8xf32>
    %21 = arith.mulf %16, %20 : vector<8x8xf32>
    %cst_9 = arith.constant dense<0.000000e+00> : vector<8x8xf32>
    %22 = tpu.matmul %21, %10, %cst_9 {dimension_numbers = #tpu.dot_dimension_numbers<[1], [0], [0], [1], [0, 0, 1, 1], [], []>} : vector<8x8xf32>, vector<8x8xf32>, vector<8x8xf32> -> vector<8x8xf32>
    %c0_10 = arith.constant 0 : index
    %c0_11 = arith.constant 0 : index
    %23 = vector.load %arg7[%c0_10, %c0_11] : memref<16x32xf32, #tpu.memory_space<vmem>>, vector<8x8xf32>
    tpu.vector_store %arg7[%c0_10, %c0_11], %22 {strides = array<i32>} : memref<16x32xf32, #tpu.memory_space<vmem>>, vector<8x8xf32>,
    %24 = vector.extract_strided_slice %5 {offsets = [0, 8], sizes = [8, 8], strides = [1, 1]} : vector<16x96xf32> to vector<8x8xf32>
    %cst_12 = arith.constant 0.353553385 : f32
    %25 = vector.broadcast %cst_12 : f32 to vector<8x8xf32>
    %26 = arith.mulf %24, %25 : vector<8x8xf32>
    %27 = vector.extract_strided_slice %5 {offsets = [0, 40], sizes = [8, 8], strides = [1, 1]} : vector<16x96xf32> to vector<8x8xf32>
    %28 = vector.extract_strided_slice %5 {offsets = [0, 72], sizes = [8, 8], strides = [1, 1]} : vector<16x96xf32> to vector<8x8xf32>
    %cst_13 = arith.constant dense<0.000000e+00> : vector<8x8xf32>
    %29 = tpu.matmul %26, %27, %cst_13 {dimension_numbers = #tpu.dot_dimension_numbers<[1], [1], [0], [0], [0, 0, 1, 0], [], []>} : vector<8x8xf32>, vector<8x8xf32>, vector<8x8xf32> -> vector<8x8xf32>
    %cst_14 = arith.constant dense<0xFF800000> : vector<8xf32>
    %30 = vector.multi_reduction <maximumf>, %29, %cst_14 [1] : vector<8x8xf32> to vector<8xf32>
    %31 = vector.shape_cast %30 : vector<8xf32> to vector<8x1xf32>
    %32 = vector.broadcast %31 : vector<8x1xf32> to vector<8x8xf32>
    %33 = arith.subf %29, %32 : vector<8x8xf32>
    %34 = math.exp %33 : vector<8x8xf32>
    %cst_15 = arith.constant dense<0.000000e+00> : vector<8xf32>
    %35 = vector.multi_reduction <add>, %34, %cst_15 [1] : vector<8x8xf32> to vector<8xf32>
    %36 = vector.shape_cast %35 : vector<8xf32> to vector<8x1xf32>
    %37 = tpu.reciprocal %36 : vector<8x1xf32> -> vector<8x1xf32>
    %38 = vector.broadcast %37 : vector<8x1xf32> to vector<8x8xf32>
    %39 = arith.mulf %34, %38 : vector<8x8xf32>
    %cst_16 = arith.constant dense<0.000000e+00> : vector<8x8xf32>
    %40 = tpu.matmul %39, %28, %cst_16 {dimension_numbers = #tpu.dot_dimension_numbers<[1], [0], [0], [1], [0, 0, 1, 1], [], []>} : vector<8x8xf32>, vector<8x8xf32>, vector<8x8xf32> -> vector<8x8xf32>
    %c0_17 = arith.constant 0 : index
    %c8 = arith.constant 8 : index
    %41 = vector.load %arg7[%c0_17, %c8] : memref<16x32xf32, #tpu.memory_space<vmem>>, vector<8x8xf32>
    tpu.vector_store %arg7[%c0_17, %c8], %40 {strides = array<i32>} : memref<16x32xf32, #tpu.memory_space<vmem>>, vector<8x8xf32>,
    %42 = vector.extract_strided_slice %5 {offsets = [0, 16], sizes = [8, 8], strides = [1, 1]} : vector<16x96xf32> to vector<8x8xf32>
    %cst_18 = arith.constant 0.353553385 : f32
    %43 = vector.broadcast %cst_18 : f32 to vector<8x8xf32>
    %44 = arith.mulf %42, %43 : vector<8x8xf32>
    %45 = vector.extract_strided_slice %5 {offsets = [0, 48], sizes = [8, 8], strides = [1, 1]} : vector<16x96xf32> to vector<8x8xf32>
    %46 = vector.extract_strided_slice %5 {offsets = [0, 80], sizes = [8, 8], strides = [1, 1]} : vector<16x96xf32> to vector<8x8xf32>
    %cst_19 = arith.constant dense<0.000000e+00> : vector<8x8xf32>
    %47 = tpu.matmul %44, %45, %cst_19 {dimension_numbers = #tpu.dot_dimension_numbers<[1], [1], [0], [0], [0, 0, 1, 0], [], []>} : vector<8x8xf32>, vector<8x8xf32>, vector<8x8xf32> -> vector<8x8xf32>
    %cst_20 = arith.constant dense<0xFF800000> : vector<8xf32>
    %48 = vector.multi_reduction <maximumf>, %47, %cst_20 [1] : vector<8x8xf32> to vector<8xf32>
    %49 = vector.shape_cast %48 : vector<8xf32> to vector<8x1xf32>
    %50 = vector.broadcast %49 : vector<8x1xf32> to vector<8x8xf32>
    %51 = arith.subf %47, %50 : vector<8x8xf32>
    %52 = math.exp %51 : vector<8x8xf32>
    %cst_21 = arith.constant dense<0.000000e+00> : vector<8xf32>
    %53 = vector.multi_reduction <add>, %52, %cst_21 [1] : vector<8x8xf32> to vector<8xf32>
    %54 = vector.shape_cast %53 : vector<8xf32> to vector<8x1xf32>
    %55 = tpu.reciprocal %54 : vector<8x1xf32> -> vector<8x1xf32>
    %56 = vector.broadcast %55 : vector<8x1xf32> to vector<8x8xf32>
    %57 = arith.mulf %52, %56 : vector<8x8xf32>
    %cst_22 = arith.constant dense<0.000000e+00> : vector<8x8xf32>
    %58 = tpu.matmul %57, %46, %cst_22 {dimension_numbers = #tpu.dot_dimension_numbers<[1], [0], [0], [1], [0, 0, 1, 1], [], []>} : vector<8x8xf32>, vector<8x8xf32>, vector<8x8xf32> -> vector<8x8xf32>
    %c0_23 = arith.constant 0 : index
    %c16 = arith.constant 16 : index
    %59 = vector.load %arg7[%c0_23, %c16] : memref<16x32xf32, #tpu.memory_space<vmem>>, vector<8x8xf32>
    tpu.vector_store %arg7[%c0_23, %c16], %58 {strides = array<i32>} : memref<16x32xf32, #tpu.memory_space<vmem>>, vector<8x8xf32>,
    %60 = vector.extract_strided_slice %5 {offsets = [0, 24], sizes = [8, 8], strides = [1, 1]} : vector<16x96xf32> to vector<8x8xf32>
    %cst_24 = arith.constant 0.353553385 : f32
    %61 = vector.broadcast %cst_24 : f32 to vector<8x8xf32>
    %62 = arith.mulf %60, %61 : vector<8x8xf32>
    %63 = vector.extract_strided_slice %5 {offsets = [0, 56], sizes = [8, 8], strides = [1, 1]} : vector<16x96xf32> to vector<8x8xf32>
    %64 = vector.extract_strided_slice %5 {offsets = [0, 88], sizes = [8, 8], strides = [1, 1]} : vector<16x96xf32> to vector<8x8xf32>
    %cst_25 = arith.constant dense<0.000000e+00> : vector<8x8xf32>
    %65 = tpu.matmul %62, %63, %cst_25 {dimension_numbers = #tpu.dot_dimension_numbers<[1], [1], [0], [0], [0, 0, 1, 0], [], []>} : vector<8x8xf32>, vector<8x8xf32>, vector<8x8xf32> -> vector<8x8xf32>
    %cst_26 = arith.constant dense<0xFF800000> : vector<8xf32>
    %66 = vector.multi_reduction <maximumf>, %65, %cst_26 [1] : vector<8x8xf32> to vector<8xf32>
    %67 = vector.shape_cast %66 : vector<8xf32> to vector<8x1xf32>
    %68 = vector.broadcast %67 : vector<8x1xf32> to vector<8x8xf32>
    %69 = arith.subf %65, %68 : vector<8x8xf32>
    %70 = math.exp %69 : vector<8x8xf32>
    %cst_27 = arith.constant dense<0.000000e+00> : vector<8xf32>
    %71 = vector.multi_reduction <add>, %70, %cst_27 [1] : vector<8x8xf32> to vector<8xf32>
    %72 = vector.shape_cast %71 : vector<8xf32> to vector<8x1xf32>
    %73 = tpu.reciprocal %72 : vector<8x1xf32> -> vector<8x1xf32>
    %74 = vector.broadcast %73 : vector<8x1xf32> to vector<8x8xf32>
    %75 = arith.mulf %70, %74 : vector<8x8xf32>
    %cst_28 = arith.constant dense<0.000000e+00> : vector<8x8xf32>
    %76 = tpu.matmul %75, %64, %cst_28 {dimension_numbers = #tpu.dot_dimension_numbers<[1], [0], [0], [1], [0, 0, 1, 1], [], []>} : vector<8x8xf32>, vector<8x8xf32>, vector<8x8xf32> -> vector<8x8xf32>
    %c0_29 = arith.constant 0 : index
    %c24 = arith.constant 24 : index
    %77 = vector.load %arg7[%c0_29, %c24] : memref<16x32xf32, #tpu.memory_space<vmem>>, vector<8x8xf32>
    tpu.vector_store %arg7[%c0_29, %c24], %76 {strides = array<i32>} : memref<16x32xf32, #tpu.memory_space<vmem>>, vector<8x8xf32>,
    %78 = vector.extract_strided_slice %5 {offsets = [8, 0], sizes = [8, 8], strides = [1, 1]} : vector<16x96xf32> to vector<8x8xf32>
    %cst_30 = arith.constant 0.353553385 : f32
    %79 = vector.broadcast %cst_30 : f32 to vector<8x8xf32>
    %80 = arith.mulf %78, %79 : vector<8x8xf32>
    %81 = vector.extract_strided_slice %5 {offsets = [8, 32], sizes = [8, 8], strides = [1, 1]} : vector<16x96xf32> to vector<8x8xf32>
    %82 = vector.extract_strided_slice %5 {offsets = [8, 64], sizes = [8, 8], strides = [1, 1]} : vector<16x96xf32> to vector<8x8xf32>
    %cst_31 = arith.constant dense<0.000000e+00> : vector<8x8xf32>
    %83 = tpu.matmul %80, %81, %cst_31 {dimension_numbers = #tpu.dot_dimension_numbers<[1], [1], [0], [0], [0, 0, 1, 0], [], []>} : vector<8x8xf32>, vector<8x8xf32>, vector<8x8xf32> -> vector<8x8xf32>
    %cst_32 = arith.constant dense<0xFF800000> : vector<8xf32>
    %84 = vector.multi_reduction <maximumf>, %83, %cst_32 [1] : vector<8x8xf32> to vector<8xf32>
    %85 = vector.shape_cast %84 : vector<8xf32> to vector<8x1xf32>
    %86 = vector.broadcast %85 : vector<8x1xf32> to vector<8x8xf32>
    %87 = arith.subf %83, %86 : vector<8x8xf32>
    %88 = math.exp %87 : vector<8x8xf32>
    %cst_33 = arith.constant dense<0.000000e+00> : vector<8xf32>
    %89 = vector.multi_reduction <add>, %88, %cst_33 [1] : vector<8x8xf32> to vector<8xf32>
    %90 = vector.shape_cast %89 : vector<8xf32> to vector<8x1xf32>
    %91 = tpu.reciprocal %90 : vector<8x1xf32> -> vector<8x1xf32>
    %92 = vector.broadcast %91 : vector<8x1xf32> to vector<8x8xf32>
    %93 = arith.mulf %88, %92 : vector<8x8xf32>
    %cst_34 = arith.constant dense<0.000000e+00> : vector<8x8xf32>
    %94 = tpu.matmul %93, %82, %cst_34 {dimension_numbers = #tpu.dot_dimension_numbers<[1], [0], [0], [1], [0, 0, 1, 1], [], []>} : vector<8x8xf32>, vector<8x8xf32>, vector<8x8xf32> -> vector<8x8xf32>
    %c8_35 = arith.constant 8 : index
    %c0_36 = arith.constant 0 : index
    %95 = vector.load %arg7[%c8_35, %c0_36] : memref<16x32xf32, #tpu.memory_space<vmem>>, vector<8x8xf32>
    tpu.vector_store %arg7[%c8_35, %c0_36], %94 {strides = array<i32>} : memref<16x32xf32, #tpu.memory_space<vmem>>, vector<8x8xf32>,
    %96 = vector.extract_strided_slice %5 {offsets = [8, 8], sizes = [8, 8], strides = [1, 1]} : vector<16x96xf32> to vector<8x8xf32>
    %cst_37 = arith.constant 0.353553385 : f32
    %97 = vector.broadcast %cst_37 : f32 to vector<8x8xf32>
    %98 = arith.mulf %96, %97 : vector<8x8xf32>
    %99 = vector.extract_strided_slice %5 {offsets = [8, 40], sizes = [8, 8], strides = [1, 1]} : vector<16x96xf32> to vector<8x8xf32>
    %100 = vector.extract_strided_slice %5 {offsets = [8, 72], sizes = [8, 8], strides = [1, 1]} : vector<16x96xf32> to vector<8x8xf32>
    %cst_38 = arith.constant dense<0.000000e+00> : vector<8x8xf32>
    %101 = tpu.matmul %98, %99, %cst_38 {dimension_numbers = #tpu.dot_dimension_numbers<[1], [1], [0], [0], [0, 0, 1, 0], [], []>} : vector<8x8xf32>, vector<8x8xf32>, vector<8x8xf32> -> vector<8x8xf32>
    %cst_39 = arith.constant dense<0xFF800000> : vector<8xf32>
    %102 = vector.multi_reduction <maximumf>, %101, %cst_39 [1] : vector<8x8xf32> to vector<8xf32>
    %103 = vector.shape_cast %102 : vector<8xf32> to vector<8x1xf32>
    %104 = vector.broadcast %103 : vector<8x1xf32> to vector<8x8xf32>
    %105 = arith.subf %101, %104 : vector<8x8xf32>
    %106 = math.exp %105 : vector<8x8xf32>
    %cst_40 = arith.constant dense<0.000000e+00> : vector<8xf32>
    %107 = vector.multi_reduction <add>, %106, %cst_40 [1] : vector<8x8xf32> to vector<8xf32>
    %108 = vector.shape_cast %107 : vector<8xf32> to vector<8x1xf32>
    %109 = tpu.reciprocal %108 : vector<8x1xf32> -> vector<8x1xf32>
    %110 = vector.broadcast %109 : vector<8x1xf32> to vector<8x8xf32>
    %111 = arith.mulf %106, %110 : vector<8x8xf32>
    %cst_41 = arith.constant dense<0.000000e+00> : vector<8x8xf32>
    %112 = tpu.matmul %111, %100, %cst_41 {dimension_numbers = #tpu.dot_dimension_numbers<[1], [0], [0], [1], [0, 0, 1, 1], [], []>} : vector<8x8xf32>, vector<8x8xf32>, vector<8x8xf32> -> vector<8x8xf32>
    %c8_42 = arith.constant 8 : index
    %c8_43 = arith.constant 8 : index
    %113 = vector.load %arg7[%c8_42, %c8_43] : memref<16x32xf32, #tpu.memory_space<vmem>>, vector<8x8xf32>
    tpu.vector_store %arg7[%c8_42, %c8_43], %112 {strides = array<i32>} : memref<16x32xf32, #tpu.memory_space<vmem>>, vector<8x8xf32>,
    %114 = vector.extract_strided_slice %5 {offsets = [8, 16], sizes = [8, 8], strides = [1, 1]} : vector<16x96xf32> to vector<8x8xf32>
    %cst_44 = arith.constant 0.353553385 : f32
    %115 = vector.broadcast %cst_44 : f32 to vector<8x8xf32>
    %116 = arith.mulf %114, %115 : vector<8x8xf32>
    %117 = vector.extract_strided_slice %5 {offsets = [8, 48], sizes = [8, 8], strides = [1, 1]} : vector<16x96xf32> to vector<8x8xf32>
    %118 = vector.extract_strided_slice %5 {offsets = [8, 80], sizes = [8, 8], strides = [1, 1]} : vector<16x96xf32> to vector<8x8xf32>
    %cst_45 = arith.constant dense<0.000000e+00> : vector<8x8xf32>
    %119 = tpu.matmul %116, %117, %cst_45 {dimension_numbers = #tpu.dot_dimension_numbers<[1], [1], [0], [0], [0, 0, 1, 0], [], []>} : vector<8x8xf32>, vector<8x8xf32>, vector<8x8xf32> -> vector<8x8xf32>
    %cst_46 = arith.constant dense<0xFF800000> : vector<8xf32>
    %120 = vector.multi_reduction <maximumf>, %119, %cst_46 [1] : vector<8x8xf32> to vector<8xf32>
    %121 = vector.shape_cast %120 : vector<8xf32> to vector<8x1xf32>
    %122 = vector.broadcast %121 : vector<8x1xf32> to vector<8x8xf32>
    %123 = arith.subf %119, %122 : vector<8x8xf32>
    %124 = math.exp %123 : vector<8x8xf32>
    %cst_47 = arith.constant dense<0.000000e+00> : vector<8xf32>
    %125 = vector.multi_reduction <add>, %124, %cst_47 [1] : vector<8x8xf32> to vector<8xf32>
    %126 = vector.shape_cast %125 : vector<8xf32> to vector<8x1xf32>
    %127 = tpu.reciprocal %126 : vector<8x1xf32> -> vector<8x1xf32>
    %128 = vector.broadcast %127 : vector<8x1xf32> to vector<8x8xf32>
    %129 = arith.mulf %124, %128 : vector<8x8xf32>
    %cst_48 = arith.constant dense<0.000000e+00> : vector<8x8xf32>
    %130 = tpu.matmul %129, %118, %cst_48 {dimension_numbers = #tpu.dot_dimension_numbers<[1], [0], [0], [1], [0, 0, 1, 1], [], []>} : vector<8x8xf32>, vector<8x8xf32>, vector<8x8xf32> -> vector<8x8xf32>
    %c8_49 = arith.constant 8 : index
    %c16_50 = arith.constant 16 : index
    %131 = vector.load %arg7[%c8_49, %c16_50] : memref<16x32xf32, #tpu.memory_space<vmem>>, vector<8x8xf32>
    tpu.vector_store %arg7[%c8_49, %c16_50], %130 {strides = array<i32>} : memref<16x32xf32, #tpu.memory_space<vmem>>, vector<8x8xf32>,
    %132 = vector.extract_strided_slice %5 {offsets = [8, 24], sizes = [8, 8], strides = [1, 1]} : vector<16x96xf32> to vector<8x8xf32>
    %cst_51 = arith.constant 0.353553385 : f32
    %133 = vector.broadcast %cst_51 : f32 to vector<8x8xf32>
    %134 = arith.mulf %132, %133 : vector<8x8xf32>
    %135 = vector.extract_strided_slice %5 {offsets = [8, 56], sizes = [8, 8], strides = [1, 1]} : vector<16x96xf32> to vector<8x8xf32>
    %136 = vector.extract_strided_slice %5 {offsets = [8, 88], sizes = [8, 8], strides = [1, 1]} : vector<16x96xf32> to vector<8x8xf32>
    %cst_52 = arith.constant dense<0.000000e+00> : vector<8x8xf32>
    %137 = tpu.matmul %134, %135, %cst_52 {dimension_numbers = #tpu.dot_dimension_numbers<[1], [1], [0], [0], [0, 0, 1, 0], [], []>} : vector<8x8xf32>, vector<8x8xf32>, vector<8x8xf32> -> vector<8x8xf32>
    %cst_53 = arith.constant dense<0xFF800000> : vector<8xf32>
    %138 = vector.multi_reduction <maximumf>, %137, %cst_53 [1] : vector<8x8xf32> to vector<8xf32>
    %139 = vector.shape_cast %138 : vector<8xf32> to vector<8x1xf32>
    %140 = vector.broadcast %139 : vector<8x1xf32> to vector<8x8xf32>
    %141 = arith.subf %137, %140 : vector<8x8xf32>
    %142 = math.exp %141 : vector<8x8xf32>
    %cst_54 = arith.constant dense<0.000000e+00> : vector<8xf32>
    %143 = vector.multi_reduction <add>, %142, %cst_54 [1] : vector<8x8xf32> to vector<8xf32>
    %144 = vector.shape_cast %143 : vector<8xf32> to vector<8x1xf32>
    %145 = tpu.reciprocal %144 : vector<8x1xf32> -> vector<8x1xf32>
    %146 = vector.broadcast %145 : vector<8x1xf32> to vector<8x8xf32>
    %147 = arith.mulf %142, %146 : vector<8x8xf32>
    %cst_55 = arith.constant dense<0.000000e+00> : vector<8x8xf32>
    %148 = tpu.matmul %147, %136, %cst_55 {dimension_numbers = #tpu.dot_dimension_numbers<[1], [0], [0], [1], [0, 0, 1, 1], [], []>} : vector<8x8xf32>, vector<8x8xf32>, vector<8x8xf32> -> vector<8x8xf32>
    %c8_56 = arith.constant 8 : index
    %c24_57 = arith.constant 24 : index
    %149 = vector.load %arg7[%c8_56, %c24_57] : memref<16x32xf32, #tpu.memory_space<vmem>>, vector<8x8xf32>
    tpu.vector_store %arg7[%c8_56, %c24_57], %148 {strides = array<i32>} : memref<16x32xf32, #tpu.memory_space<vmem>>, vector<8x8xf32>,
    %c0_58 = arith.constant 0 : index
    %c0_59 = arith.constant 0 : index
    %150 = vector.load %arg7[%c0_58, %c0_59] : memref<16x32xf32, #tpu.memory_space<vmem>>, vector<16x32xf32>
    %c0_60 = arith.constant 0 : index
    %c0_61 = arith.constant 0 : index
    %151 = vector.load %arg4[%c0_60, %c0_61] : memref<32x32xf32, #tpu.memory_space<vmem>>, vector<32x32xf32>
    %cst_62 = arith.constant dense<0.000000e+00> : vector<16x32xf32>
    %152 = tpu.matmul %150, %151, %cst_62 {dimension_numbers = #tpu.dot_dimension_numbers<[1], [0], [0], [1], [0, 0, 1, 1], [], []>} : vector<16x32xf32>, vector<32x32xf32>, vector<16x32xf32> -> vector<16x32xf32>
    %c0_63 = arith.constant 0 : index
    %c0_64 = arith.constant 0 : index
    %153 = vector.load %arg5[%c0_63, %c0_64] : memref<1x32xf32, #tpu.memory_space<vmem>>, vector<1x32xf32>
    %154 = vector.broadcast %153 : vector<1x32xf32> to vector<16x32xf32>
    %155 = arith.addf %152, %154 : vector<16x32xf32>
    %c0_65 = arith.constant 0 : index
    %c0_66 = arith.constant 0 : index
    %156 = vector.load %arg6[%c0_65, %c0_66] : memref<16x32xf32, #tpu.memory_space<vmem>>, vector<16x32xf32>
    tpu.vector_store %arg6[%c0_65, %c0_66], %155 {strides = array<i32>} : memref<16x32xf32, #tpu.memory_space<vmem>>, vector<16x32xf32>,
    return
  }
  func.func @transform_0(%arg0: i32) -> (i32, i32) {
    %c0_i32 = arith.constant 0 : i32
    %c0_i32_0 = arith.constant 0 : i32
    return %arg0, %c0_i32 : i32, i32
  }
  func.func @transform_1(%arg0: i32) -> (i32, i32) {
    %c0_i32 = arith.constant 0 : i32
    %c0_i32_0 = arith.constant 0 : i32
    %c0_i32_1 = arith.constant 0 : i32
    return %c0_i32, %c0_i32_0 : i32, i32
  }
  func.func @transform_2(%arg0: i32) -> (i32, i32) {
    %c0_i32 = arith.constant 0 : i32
    %c0_i32_0 = arith.constant 0 : i32
    %c0_i32_1 = arith.constant 0 : i32
    return %c0_i32, %c0_i32_0 : i32, i32
  }
  func.func @transform_3(%arg0: i32) -> (i32, i32) {
    %c0_i32 = arith.constant 0 : i32
    %c0_i32_0 = arith.constant 0 : i32
    %c0_i32_1 = arith.constant 0 : i32
    return %c0_i32, %c0_i32_0 : i32, i32
  }
  func.func @transform_4(%arg0: i32) -> (i32, i32) {
    %c0_i32 = arith.constant 0 : i32
    %c0_i32_0 = arith.constant 0 : i32
    %c0_i32_1 = arith.constant 0 : i32
    return %c0_i32, %c0_i32_0 : i32, i32
  }
  func.func @transform_5(%arg0: i32) -> (i32, i32) {
    %c0_i32 = arith.constant 0 : i32
    %c0_i32_0 = arith.constant 0 : i32
    return %arg0, %c0_i32 : i32, i32
  }
}

</mosaic_0001>

<bundles_post_ra>
// kernel: tpu_custom_call.1
= control target key start
LH: loop header
LB: loop body
LE: loop exit
PB: predicated region body
PF: predicated region fallthrough
CT: control target
= control target key end

     0   :  { %10 = vsyncpa [#allocation4], 0  ;;  %s1239_s0 = inlined_call_operand.hbm [shape: f32[16,32], index: 0, kind: input, shape index: {}]   ;;  %s1240_s1 = inlined_call_operand.hbm [shape: f32[32,96], index: 1, kind: input, shape index: {}]   ;;  %s1241_s2 = inlined_call_operand.vmem [shape: f32[1,96], index: 2, kind: input, shape index: {}]   ;;  %s1242_s3 = inlined_call_operand.hbm [shape: f32[32,32], index: 3, kind: input, shape index: {}]   ;;  %s1243_s4 = inlined_call_operand.vmem [shape: f32[1,32], index: 4, kind: input, shape index: {}]   ;;  %s1244_s5 = inlined_call_operand.hbm [shape: f32[16,32], index: 5, kind: output, shape index: {}]  }
   0x1   :  { %11 = vsyncpa [#allocation7], 0 }
   0x2   :  { %12 = vsyncpa [#allocation5], 0  ;;  %s30_s20 = sshll.u32 %s1240_s1, 4  ;;  %s1014_s21 = smov [#allocation6]   ;;  %s31_s20 = int_to_ptr.hbm [resolvable:$true] %s30_s20 }
   0x3   :  { %s32_s22 = sshll.u32 %s1014_s21, 4  ;;  %s17_s25 = sshll.u32 %s1239_s0, 4  ;;  %s33_s22 = int_to_ptr.vmem [resolvable:$true] %s32_s22  ;;  %s18_s25 = int_to_ptr.hbm [resolvable:$true] %s17_s25 }
   0x4   :  { %s1015_s26 = smov 128   ;;  %s1016_s27 = smov 8  }
   0x5   :  { %38 = dma.hbm_to_vmem [thread:$0]  %s31_s20, 512, %s33_s22, [#allocation7], %s1015_s26, %s1015_s26, %s1016_s27  }
   0x6   :  { %s1017_s28 = smov [#allocation3]   ;;  %s45_s1 = sshll.u32 %s1242_s3, 4  ;;  %s46_s1 = int_to_ptr.hbm [resolvable:$true] %s45_s1 }
   0x7   :  { %s19_s29 = sshll.u32 %s1017_s28, 4  ;;  %s1018_s0 = smov [#allocation8]   ;;  %s20_s29 = int_to_ptr.vmem [resolvable:$true] %s19_s29 }
   0x8   :  { %25 = dma.hbm_to_vmem [thread:$0]  %s18_s25, 256, %s20_s29, [#allocation4], %s1015_s26, %s1015_s26, %s1016_s27  }
   0x9   :  { %s47_s7 = sshll.u32 %s1018_s0, 4  ;;  %s48_s7 = int_to_ptr.vmem [resolvable:$true] %s47_s7 }
   0xa   :  { %53 = dma.hbm_to_vmem [thread:$0]  %s46_s1, 512, %s48_s7, [#allocation7], %s1015_s26, %s1015_s26, %s1016_s27  }
   0xb   :  { %1008 = dma.done.wait [#allocation4], 256  }
   0xc   :  { %1009 = vsyncadd [#allocation4], 4294967040 }
   0xd   :  { %1010 = dma.done.wait [#allocation7], 1024  }
   0xe   :  { %1011 = vsyncadd [#allocation7], 4294966272  ;;  %v73_v0 = vld [vmem:[#allocation6 + $0x18] sm:$0xff]  ;;  %v72_v1 = vld [vmem:[#allocation6 + $0x10] sm:$0xff]  ;;  %vm78_vm0 = vcmask 261120   ;;  %s1019_s9 = smov 96  }
   0xf   :  { %97 = vmatpush.msra.mxu0 %v73_v0  ;;  %v71_v2 = vld [vmem:[#allocation6 + $0x8] sm:$0xff]  ;;  %v70_v3 = vld [vmem:[#allocation6] sm:$0xff]  ;;  %v68_v4 = vld [vmem:[#allocation3] sm:$0xff]  ;;  %s1020_s10 = smov 112   ;;  %s1021_s11 = smov 120   ;;  %vm112_vm1 = vcmask 64512  }
  0x10   :  { %v878_v5 = vld [vmem:[%s1241_s2] ss:$0 sm:$0xff]  ;;  %s1022_s12 = smov 88   ;;  %s1023_s2 = smov 80   ;;  %v69_v9 = vld [vmem:[#allocation3 + $0x8] sm:$0xff] }
  0x11   :  { %98 = vmatpush.msra.mxu0 %v72_v1  ;;  %s1024_s13 = smov 56   ;;  %s1025_s14 = smov 72  }
  0x12   :  { %s1026_s15 = smov 64   ;;  %s1027_s16 = smov 104  }
  0x13   :  { %99 = vmatpush.msra.mxu0 %v71_v2  ;;  %s1028_s17 = smov 48   ;;  %s1029_s18 = smov 40  }
  0x14   :  { %s1030_s19 = smov 16   ;;  %s1031_s20 = smov 24  }
  0x15   :  { %100 = vmatpush.msra.mxu0 %v70_v3  ;;  %s1032_s23 = smov [#allocation9]   ;;  %s817_s29 = sshll.u32 %s1244_s5, 4  ;;  %s818_s29 = int_to_ptr.hbm [resolvable:$true] %s817_s29 }
  0x16   :  { %831 = vmatmul.msk.f32.vlgmr.msra.gmra.mxu0 %vm78_vm0, %v68_v4  ;;  %s815_s24 = sshll.u32 %s1032_s23, 4  ;;  %s816_s24 = int_to_ptr.vmem [resolvable:$true] %s815_s24 }
  0x1e   :  { %832 = vmatmul.msk.f32.gmra.mxu0 %vm78_vm0, %v69_v9 }
  0x93   :  { %v102_v6 = vpop.f32.mrf.mxu0 }
  0x94   :  { %v1085_v7 = vadd.f32 %v878_v5, %v102_v6 }
  0x96   :  { %110 = vrot.lane.b32.xlu0 %v1085_v7, %s1019_s9  ;;  %v108_v8 = vmul.f32 0.35355338, %v1085_v7 }
  0x98   :  { %273 = vrot.lane.b32.xlu2 %v108_v8, %s1020_s10  ;;  %189 = vrot.lane.b32.xlu1 %v108_v8, %s1021_s11 }
  0x9b   :  { %v105_v15 = vpop.f32.mrf.mxu0 }
  0x9c   :  { %v1109_v22 = vadd.f32 %v878_v5, %v105_v15 }
  0x9e   :  { %191 = vrot.lane.b32.xlu0 %v1085_v7, %s1022_s12  ;;  %v1117_v23 = vmul.f32 0.35355338, %v1109_v22 }
  0xa0   :  { %275 = vrot.lane.b32.xlu1 %v1085_v7, %s1023_s2 }
  0xf2   :  { %v274_v14 = vpop.permute.xlu2 %273 }
 0x108   :  { %v111_v10 = vpop.permute.xlu0 %110 }
 0x109   :  { %833 = vmatpush.xpose.msk.msra.mxu1 %vm112_vm1, %v111_v10 }
 0x10a   :  { %v190_v11 = vpop.permute.xlu1 %189 }
 0x10c   :  { %834 = vmatmul.msk.f32.vlgmr.msra.gmra.mxu1 %vm112_vm1, %v108_v8 }
 0x110   :  { %v192_v12 = vpop.permute.xlu0 %191 }
 0x111   :  { %836 = vmatpush.xpose.msk.msrb.mxu0 %vm112_vm1, %v192_v12 }
 0x112   :  { %v276_v13 = vpop.permute.xlu1 %275 }
 0x113   :  { %839 = vmatpush.xpose.msk.msrb.mxu1 %vm112_vm1, %v276_v13 }
 0x114   :  { %837 = vmatmul.msk.f32.vlgmr.msrb.gmra.mxu0 %vm112_vm1, %v190_v11 }
 0x116   :  { %840 = vmatmul.msk.f32.vlgmr.msrb.gmra.mxu1 %vm112_vm1, %v274_v14 }
 0x189   :  { %v135_v16 = vpop.f32.mrf.mxu1 }
 0x18a   :  { %v138_v17 = vsel %vm112_vm1, %v135_v16, -inf }
 0x18b   :  { %139 = vmax.xlane.f32.xlu2 %v138_v17 }
 0x191   :  { %v214_v18 = vpop.f32.mrf.mxu0 }
 0x192   :  { %v217_v19 = vsel %vm112_vm1, %v214_v18, -inf }
 0x193   :  { %218 = vmax.xlane.f32.xlu0 %v217_v19  ;;  %v298_v20 = vpop.f32.mrf.mxu1 }
 0x194   :  { %v301_v21 = vsel %vm112_vm1, %v298_v20, -inf }
 0x195   :  { %302 = vmax.xlane.f32.xlu1 %v301_v21 }
 0x1a3   :  { %241 = vrot.lane.b32.xlu2 %v1085_v7, %s1024_s13 }
 0x1a7   :  { %359 = vrot.lane.b32.xlu0 %v1085_v7, %s1025_s14 }
 0x1ab   :  { %443 = vrot.lane.b32.xlu2 %v1109_v22, %s1019_s9 }
 0x1ae   :  { %162 = vrot.lane.b32.xlu1 %v1085_v7, %s1026_s15 }
 0x1af   :  { %357 = vrot.lane.b32.xlu0 %v108_v8, %s1027_s16 }
 0x1b6   :  { %325 = vrot.lane.b32.xlu1 %v1085_v7, %s1028_s17 }
 0x1b7   :  { %521 = vrot.lane.b32.xlu0 %v1117_v23, %s1021_s11 }
 0x1be   :  { %523 = vrot.lane.b32.xlu1 %v1109_v22, %s1022_s12 }
 0x1c6   :  { %689 = vrot.lane.b32.xlu1 %v1109_v22, %s1025_s14 }
 0x1fe   :  { %v140_v24 = vpop.xlane.xlu2 %139 }
 0x1ff   :  { %v141_v25 = vsub.f32 %v135_v16, %v140_v24 }
 0x201   :  { %v142_v26 = vmul.f32 1.442695, %v141_v25 }
 0x203   :  { %880 = vpow2.f32 %v142_v26 }
 0x206   :  { %v219_v27 = vpop.xlane.xlu0 %218  ;;  %v242_v39 = vpop.permute.xlu2 %241 }
 0x207   :  { %v220_v28 = vsub.f32 %v214_v18, %v219_v27 }
 0x208   :  { %v303_v29 = vpop.xlane.xlu1 %302 }
 0x209   :  { %v881_v30 = vpop.eup %880  ;;  %v221_v31 = vmul.f32 1.442695, %v220_v28  ;;  %v304_v32 = vsub.f32 %v298_v20, %v303_v29 }
 0x20a   :  { %v144_v33 = vsel %vm112_vm1, %v881_v30, 0.0 }
 0x20b   :  { %882 = vpow2.f32 %v221_v31  ;;  %v305_v34 = vmul.f32 1.442695, %v304_v32  ;;  %145 = vadd.xlane.f32.xlu2 %v144_v33 }
 0x20d   :  { %884 = vpow2.f32 %v305_v34 }
 0x20e   :  { %v444_v42 = vpop.permute.xlu2 %443 }
 0x211   :  { %v1127_v35 = vpop.eup %882 }
 0x212   :  { %v223_v36 = vsel %vm112_vm1, %v1127_v35, 0.0 }
 0x213   :  { %v1131_v37 = vpop.eup %884  ;;  %224 = vadd.xlane.f32.xlu2 %v223_v36 }
 0x214   :  { %v307_v38 = vsel %vm112_vm1, %v1131_v37, 0.0 }
 0x215   :  { %308 = vadd.xlane.f32.xlu0 %v307_v38 }
 0x219   :  { %v360_v43 = vpop.permute.xlu0 %359 }
 0x220   :  { %v163_v40 = vpop.permute.xlu1 %162 }
 0x221   :  { %183 = vmatpush.msra.mxu2 %v163_v40  ;;  %v358_v44 = vpop.permute.xlu0 %357 }
 0x223   :  { %262 = vmatpush.msrb.mxu2 %v242_v39 }
 0x228   :  { %v326_v41 = vpop.permute.xlu1 %325 }
 0x229   :  { %604 = vrot.lane.b32.xlu0 %v1117_v23, %s1020_s10  ;;  %346 = vmatpush.msra.mxu3 %v326_v41  ;;  %v522_v46 = vpop.permute.xlu0 %521 }
 0x22b   :  { %845 = vmatpush.xpose.msk.msrb.mxu3 %vm112_vm1, %v444_v42  ;;  %606 = vrot.lane.b32.xlu2 %v1109_v22, %s1023_s2 }
 0x230   :  { %v524_v15 = vpop.permute.xlu1 %523 }
 0x233   :  { %687 = vrot.lane.b32.xlu2 %v1117_v23, %s1027_s16 }
 0x238   :  { %v690_v21 = vpop.permute.xlu1 %689 }
 0x27e   :  { %v146_v45 = vpop.xlane.xlu2 %145 }
 0x27f   :  { %886 = vrcp.f32 %v146_v45  ;;  %v158_v52 = vand.u32 2147483648, %v146_v45  ;;  %v156_v54 = vand.u32 2147483647, %v146_v45  ;;  %vm152_vm3 = vweird.f32 %v146_v45 }
 0x281   :  { %v159_v57 = vor.u32 1.1754944e-38, %v158_v52  ;;  %vm157_vm5 = vcmp.eq.f32.partialorder %v156_v54, 8.507059e+37 }
 0x285   :  { %v887_v47 = vpop.eup %886 }
 0x286   :  { %v148_v48 = vmul.f32 %v887_v47, %v146_v45  ;;  %v225_v49 = vpop.xlane.xlu2 %224  ;;  %vm153_vm2 = vweird.f32 %v887_v47 }
 0x287   :  { %888 = vrcp.f32 %v225_v49  ;;  %vm154_vm4 = vmor %vm152_vm3, %vm153_vm2  ;;  %v237_v1 = vand.u32 2147483648, %v225_v49  ;;  %v235_v3 = vand.u32 2147483647, %v225_v49  ;;  %vm231_vm7 = vweird.f32 %v225_v49 }
 0x288   :  { %v149_v50 = vsub.f32 1.0, %v148_v48  ;;  %v309_v51 = vpop.xlane.xlu0 %308 }
 0x289   :  { %890 = vrcp.f32 %v309_v51  ;;  %v321_v5 = vand.u32 2147483648, %v309_v51  ;;  %v319_v9 = vand.u32 2147483647, %v309_v51  ;;  %v238_v10 = vor.u32 1.1754944e-38, %v237_v1 }
 0x28a   :  { %v150_v53 = vmul.f32 %v887_v47, %v149_v50  ;;  %vm236_vm10 = vcmp.eq.f32.partialorder %v235_v3, 8.507059e+37  ;;  %vm315_vm11 = vweird.f32 %v309_v51 }
 0x28b   :  { %v322_v13 = vor.u32 1.1754944e-38, %v321_v5  ;;  %vm320_vm13 = vcmp.eq.f32.partialorder %v319_v9, 8.507059e+37 }
 0x28c   :  { %v151_v55 = vadd.f32 %v887_v47, %v150_v53 }
 0x28d   :  { %v889_v56 = vpop.eup %888 }
 0x28e   :  { %v227_v58 = vmul.f32 %v889_v56, %v225_v49  ;;  %v155_v59 = vsel %vm154_vm4, %v887_v47, %v151_v55  ;;  %vm232_vm6 = vweird.f32 %v889_v56  ;;  %v607_v20 = vpop.permute.xlu2 %606 }
 0x28f   :  { %v891_v60 = vpop.eup %890  ;;  %v160_v61 = vsel %vm157_vm5, %v159_v57, %v155_v59  ;;  %vm233_vm9 = vmor %vm231_vm7, %vm232_vm6 }
 0x290   :  { %v228_v62 = vsub.f32 1.0, %v227_v58  ;;  %v311_v63 = vmul.f32 %v891_v60, %v309_v51  ;;  %v161_v0 = vmul.f32 %v881_v30, %v160_v61  ;;  %vm316_vm8 = vweird.f32 %v891_v60 }
 0x291   :  { %vm317_vm12 = vmor %vm315_vm11, %vm316_vm8 }
 0x292   :  { %v229_v2 = vmul.f32 %v889_v56, %v228_v62  ;;  %v312_v4 = vsub.f32 1.0, %v311_v63  ;;  %835 = vmatmul.msk.f32.vlgmr.msra.gmra.mxu2 %vm112_vm1, %v161_v0 }
 0x293   :  { %842 = vmatpush.xpose.msk.msra.mxu2 %vm112_vm1, %v360_v43 }
 0x294   :  { %v230_v6 = vadd.f32 %v889_v56, %v229_v2  ;;  %v313_v8 = vmul.f32 %v891_v60, %v312_v4 }
 0x296   :  { %v234_v11 = vsel %vm233_vm9, %v889_v56, %v230_v6  ;;  %v314_v12 = vadd.f32 %v891_v60, %v313_v8  ;;  %v688_v25 = vpop.permute.xlu2 %687 }
 0x297   :  { %v239_v14 = vsel %vm236_vm10, %v238_v10, %v234_v11 }
 0x298   :  { %v240_v16 = vmul.f32 %v1127_v35, %v239_v14  ;;  %v318_v17 = vsel %vm317_vm12, %v891_v60, %v314_v12 }
 0x299   :  { %v323_v18 = vsel %vm320_vm13, %v322_v13, %v318_v17 }
 0x29a   :  { %838 = vmatmul.msk.f32.vlgmr.msrb.gmra.mxu2 %vm112_vm1, %v240_v16  ;;  %v324_v19 = vmul.f32 %v1131_v37, %v323_v18 }
 0x29b   :  { %848 = vmatpush.xpose.msk.msrb.mxu2 %vm112_vm1, %v524_v15  ;;  %v605_v24 = vpop.permute.xlu0 %604 }
 0x29c   :  { %841 = vmatmul.msk.f32.vlgmr.msra.gmra.mxu3 %vm112_vm1, %v324_v19 }
 0x29d   :  { %851 = vmatpush.xpose.msk.msra.mxu3 %vm112_vm1, %v607_v20 }
 0x2a2   :  { %843 = vmatmul.msk.f32.vlgmr.msra.gmra.mxu2 %vm112_vm1, %v358_v44 }
 0x2a3   :  { %854 = vmatpush.xpose.msk.msra.mxu2 %vm112_vm1, %v690_v21 }
 0x2a4   :  { %846 = vmatmul.msk.f32.vlgmr.msrb.gmra.mxu3 %vm112_vm1, %v1117_v23 }
 0x2aa   :  { %849 = vmatmul.msk.f32.vlgmr.msrb.gmra.mxu2 %vm112_vm1, %v522_v46 }
 0x2ac   :  { %852 = vmatmul.msk.f32.vlgmr.msra.gmra.mxu3 %vm112_vm1, %v605_v24 }
 0x2b2   :  { %855 = vmatmul.msk.f32.vlgmr.msra.gmra.mxu2 %vm112_vm1, %v688_v25 }
 0x315   :  { %v185_v26 = vpop.f32.mrf.mxu2 }
 0x316   :  { %188 = vst.msk [vmem:[#allocation2] sm:$0xff] %vm112_vm1, %v185_v26 }
 0x31d   :  { %v264_v27 = vpop.f32.mrf.mxu2 }
 0x31f   :  { %v348_v28 = vpop.f32.mrf.mxu3 }
 0x325   :  { %v382_v29 = vpop.f32.mrf.mxu2 }
 0x326   :  { %v385_v30 = vsel %vm112_vm1, %v382_v29, -inf }
 0x327   :  { %v467_v31 = vpop.f32.mrf.mxu3  ;;  %386 = vmax.xlane.f32.xlu1 %v385_v30 }
 0x328   :  { %v470_v23 = vsel %vm112_vm1, %v467_v31, -inf }
 0x329   :  { %471 = vmax.xlane.f32.xlu0 %v470_v23 }
 0x32d   :  { %v546_v32 = vpop.f32.mrf.mxu2 }
 0x32e   :  { %v549_v33 = vsel %vm112_vm1, %v546_v32, -inf }
 0x32f   :  { %550 = vmax.xlane.f32.xlu2 %v549_v33  ;;  %v629_v34 = vpop.f32.mrf.mxu3 }
 0x330   :  { %v632_v35 = vsel %vm112_vm1, %v629_v34, -inf }
 0x331   :  { %633 = vmax.xlane.f32.xlu1 %v632_v35 }
 0x335   :  { %v712_v36 = vpop.f32.mrf.mxu2 }
 0x336   :  { %v715_v37 = vsel %vm112_vm1, %v712_v36, -inf }
 0x337   :  { %716 = vmax.xlane.f32.xlu0 %v715_v37 }
 0x347   :  { %494 = vrot.lane.b32.xlu2 %v1109_v22, %s1026_s15 }
 0x34b   :  { %409 = vrot.lane.b32.xlu0 %v1085_v7, %s1029_s18 }
 0x39a   :  { %v387_v38 = vpop.xlane.xlu1 %386 }
 0x39b   :  { %v388_v39 = vsub.f32 %v382_v29, %v387_v38 }
 0x39c   :  { %v472_v40 = vpop.xlane.xlu0 %471 }
 0x39d   :  { %v389_v41 = vmul.f32 1.442695, %v388_v39  ;;  %v473_v42 = vsub.f32 %v467_v31, %v472_v40 }
 0x39f   :  { %892 = vpow2.f32 %v389_v41  ;;  %v474_v43 = vmul.f32 1.442695, %v473_v42 }
 0x3a1   :  { %894 = vpow2.f32 %v474_v43 }
 0x3a2   :  { %v551_v44 = vpop.xlane.xlu2 %550 }
 0x3a3   :  { %v552_v45 = vsub.f32 %v546_v32, %v551_v44 }
 0x3a4   :  { %v634_v46 = vpop.xlane.xlu1 %633 }
 0x3a5   :  { %v1167_v47 = vpop.eup %892  ;;  %v553_v48 = vmul.f32 1.442695, %v552_v45  ;;  %v635_v49 = vsub.f32 %v629_v34, %v634_v46 }
 0x3a6   :  { %v391_v50 = vsel %vm112_vm1, %v1167_v47, 0.0 }
 0x3a7   :  { %v1171_v51 = vpop.eup %894  ;;  %896 = vpow2.f32 %v553_v48  ;;  %v636_v7 = vmul.f32 1.442695, %v635_v49  ;;  %392 = vadd.xlane.f32.xlu2 %v391_v50 }
 0x3a8   :  { %v476_v52 = vsel %vm112_vm1, %v1171_v51, 0.0 }
 0x3a9   :  { %898 = vpow2.f32 %v636_v7  ;;  %477 = vadd.xlane.f32.xlu1 %v476_v52 }
 0x3aa   :  { %v717_v53 = vpop.xlane.xlu0 %716  ;;  %v495_v54 = vpop.permute.xlu2 %494 }
 0x3ab   :  { %v718_v55 = vsub.f32 %v712_v36, %v717_v53  ;;  %515 = vmatpush.msra.mxu0 %v495_v54 }
 0x3ad   :  { %v1175_v56 = vpop.eup %896  ;;  %v719_v57 = vmul.f32 1.442695, %v718_v55 }
 0x3ae   :  { %v555_v58 = vsel %vm112_vm1, %v1175_v56, 0.0 }
 0x3af   :  { %v1179_v59 = vpop.eup %898  ;;  %900 = vpow2.f32 %v719_v57  ;;  %556 = vadd.xlane.f32.xlu0 %v555_v58 }
 0x3b0   :  { %v638_v60 = vsel %vm112_vm1, %v1179_v59, 0.0 }
 0x3b1   :  { %639 = vadd.xlane.f32.xlu2 %v638_v60 }
 0x3b5   :  { %v1183_v61 = vpop.eup %900 }
 0x3b6   :  { %v721_v62 = vsel %vm112_vm1, %v1183_v61, 0.0 }
 0x3b7   :  { %722 = vadd.xlane.f32.xlu1 %v721_v62 }
 0x3bd   :  { %v410_v63 = vpop.permute.xlu0 %409 }
 0x3be   :  { %430 = vmatpush.msra.mxu1 %v410_v63 }
 0x3c3   :  { %656 = vrot.lane.b32.xlu0 %v1109_v22, %s1028_s17 }
 0x3c9   :  { %739 = vrot.lane.b32.xlu2 %v1109_v22, %s1029_s18 }
 0x3cb   :  { %268 = vrot.lane.b32.xlu0 %v264_v27, %s1016_s27 }
 0x3d0   :  { %573 = vrot.lane.b32.xlu1 %v1109_v22, %s1024_s13 }
 0x3d8   :  { %352 = vrot.lane.b32.xlu1 %v348_v28, %s1030_s19 }
 0x41a   :  { %v393_v0 = vpop.xlane.xlu2 %392 }
 0x41b   :  { %902 = vrcp.f32 %v393_v0  ;;  %v405_v10 = vand.u32 2147483648, %v393_v0  ;;  %v403_v11 = vand.u32 2147483647, %v393_v0  ;;  %vm399_vm15 = vweird.f32 %v393_v0 }
 0x41c   :  { %v478_v1 = vpop.xlane.xlu1 %477 }
 0x41d   :  { %904 = vrcp.f32 %v478_v1  ;;  %v490_v13 = vand.u32 2147483648, %v478_v1  ;;  %v488_v16 = vand.u32 2147483647, %v478_v1  ;;  %v406_v18 = vor.u32 1.1754944e-38, %v405_v10  ;;  %v772_v10 = vld [vmem:[#allocation8] sm:$0xff] }
 0x41e   :  { %vm404_vm4 = vcmp.eq.f32.partialorder %v403_v11, 8.507059e+37  ;;  %vm484_vm5 = vweird.f32 %v478_v1 }
 0x41f   :  { %v491_v26 = vor.u32 1.1754944e-38, %v490_v13  ;;  %vm489_vm7 = vcmp.eq.f32.partialorder %v488_v16, 8.507059e+37  ;;  %v879_v16 = vld [vmem:[%s1243_s4] ss:$0 sm:$0xff] }
 0x421   :  { %v903_v2 = vpop.eup %902 }
 0x422   :  { %v395_v3 = vmul.f32 %v903_v2, %v393_v0  ;;  %v1195_v4 = vpop.xlane.xlu0 %556  ;;  %vm400_vm14 = vweird.f32 %v903_v2 }
 0x423   :  { %v905_v5 = vpop.eup %904  ;;  %906 = vrcp.f32 %v1195_v4  ;;  %vm401_vm3 = vmor %vm399_vm15, %vm400_vm14  ;;  %v569_v48 = vand.u32 2147483648, %v1195_v4  ;;  %vm563_vm13 = vweird.f32 %v1195_v4  ;;  %v567_v49 = vand.u32 2147483647, %v1195_v4 }
 0x424   :  { %v396_v6 = vsub.f32 1.0, %v395_v3  ;;  %v480_v8 = vmul.f32 %v905_v5, %v478_v1  ;;  %v640_v9 = vpop.xlane.xlu2 %639  ;;  %vm485_vm2 = vweird.f32 %v905_v5  ;;  %vm271_vm15 = vcmask 130112  }
 0x425   :  { %908 = vrcp.f32 %v640_v9  ;;  %vm486_vm6 = vmor %vm484_vm5, %vm485_vm2  ;;  %v652_v33 = vand.u32 2147483648, %v640_v9  ;;  %v650_v36 = vand.u32 2147483647, %v640_v9  ;;  %vm646_vm9 = vweird.f32 %v640_v9 }
 0x426   :  { %v397_v22 = vmul.f32 %v903_v2, %v396_v6  ;;  %v481_v12 = vsub.f32 1.0, %v480_v8  ;;  %v570_v7 = vor.u32 1.1754944e-38, %v569_v48  ;;  %vm568_vm2 = vcmp.eq.f32.partialorder %v567_v49, 8.507059e+37  ;;  %v775_v8 = vld [vmem:[#allocation8 + $0x18] sm:$0xff] }
 0x427   :  { %v653_v39 = vor.u32 1.1754944e-38, %v652_v33  ;;  %vm651_vm11 = vcmp.eq.f32.partialorder %v650_v36, 8.507059e+37  ;;  %798 = vmatpush.msrb.mxu3 %v775_v8 }
 0x428   :  { %v398_v14 = vadd.f32 %v903_v2, %v397_v22  ;;  %v482_v15 = vmul.f32 %v905_v5, %v481_v12 }
 0x429   :  { %v907_v17 = vpop.eup %906 }
 0x42a   :  { %v402_v19 = vsel %vm401_vm3, %v903_v2, %v398_v14  ;;  %v483_v20 = vadd.f32 %v905_v5, %v482_v15  ;;  %v1198_v21 = vpop.xlane.xlu1 %722  ;;  %v559_v28 = vmul.f32 %v907_v17, %v1195_v4  ;;  %vm564_vm12 = vweird.f32 %v907_v17 }
 0x42b   :  { %v909_v24 = vpop.eup %908  ;;  %v407_v25 = vsel %vm404_vm4, %v406_v18, %v402_v19  ;;  %910 = vrcp.f32 %v1198_v21  ;;  %vm565_vm14 = vmor %vm563_vm13, %vm564_vm12  ;;  %v735_v55 = vand.u32 2147483648, %v1198_v21  ;;  %vm729_vm4 = vweird.f32 %v1198_v21 }
 0x42c   :  { %v487_v27 = vsel %vm486_vm6, %v905_v5, %v483_v20  ;;  %v642_v29 = vmul.f32 %v909_v24, %v640_v9  ;;  %v408_v31 = vmul.f32 %v1167_v47, %v407_v25  ;;  %v560_v34 = vsub.f32 1.0, %v559_v28  ;;  %v740_v62 = vpop.permute.xlu2 %739  ;;  %v773_v9 = vld [vmem:[#allocation8 + $0x8] sm:$0xff] }
 0x42d   :  { %v492_v30 = vsel %vm489_vm7, %v491_v26, %v487_v27  ;;  %vm647_vm8 = vweird.f32 %v909_v24  ;;  %v733_v57 = vand.u32 2147483647, %v1198_v21  ;;  %v736_v63 = vor.u32 1.1754944e-38, %v735_v55 }
 0x42e   :  { %v643_v23 = vsub.f32 1.0, %v642_v29  ;;  %v493_v32 = vmul.f32 %v1171_v51, %v492_v30  ;;  %844 = vmatmul.msk.f32.vlgmr.msra.gmra.mxu1 %vm112_vm1, %v408_v31  ;;  %vm648_vm10 = vmor %vm646_vm9, %vm647_vm8  ;;  %v561_v40 = vmul.f32 %v907_v17, %v560_v34  ;;  %vm355_vm7 = vcmask 195712  }
 0x42f   :  { %vm734_vm6 = vcmp.eq.f32.partialorder %v733_v57, 8.507059e+37  ;;  %vm439_vm8 = vcmask 261312  }
 0x430   :  { %v644_v35 = vmul.f32 %v909_v24, %v643_v23  ;;  %847 = vmatmul.msk.f32.vlgmr.msra.gmra.mxu0 %vm112_vm1, %v493_v32  ;;  %v562_v46 = vadd.f32 %v907_v17, %v561_v40 }
 0x431   :  { %v911_v37 = vpop.eup %910 }
 0x432   :  { %v645_v38 = vadd.f32 %v909_v24, %v644_v35  ;;  %v725_v42 = vmul.f32 %v911_v37, %v1198_v21  ;;  %v566_v50 = vsel %vm565_vm14, %v907_v17, %v562_v46  ;;  %vm730_vm3 = vweird.f32 %v911_v37 }
 0x433   :  { %v571_v53 = vsel %vm568_vm2, %v570_v7, %v566_v50  ;;  %vm731_vm5 = vmor %vm729_vm4, %vm730_vm3 }
 0x434   :  { %v649_v41 = vsel %vm648_vm10, %v909_v24, %v645_v38  ;;  %v726_v47 = vsub.f32 1.0, %v725_v42 }
 0x435   :  { %v654_v43 = vsel %vm651_vm11, %v653_v39, %v649_v41  ;;  %v657_v44 = vpop.permute.xlu0 %656 }
 0x436   :  { %677 = vmatpush.msrb.mxu0 %v657_v44  ;;  %v655_v45 = vmul.f32 %v1179_v59, %v654_v43  ;;  %v727_v51 = vmul.f32 %v911_v37, %v726_v47  ;;  %v572_v59 = vmul.f32 %v1175_v56, %v571_v53 }
 0x438   :  { %853 = vmatmul.msk.f32.vlgmr.msrb.gmra.mxu0 %vm112_vm1, %v655_v45  ;;  %v728_v54 = vadd.f32 %v911_v37, %v727_v51 }
 0x43a   :  { %v732_v60 = vsel %vm731_vm5, %v911_v37, %v728_v54 }
 0x43b   :  { %v737_v0 = vsel %vm734_vm6, %v736_v63, %v732_v60 }
 0x43c   :  { %v738_v2 = vmul.f32 %v1183_v61, %v737_v0  ;;  %v774_v61 = vld [vmem:[#allocation8 + $0x10] sm:$0xff] }
 0x43d   :  { %v269_v52 = vpop.permute.xlu0 %268  ;;  %799 = vmatpush.msrb.mxu3 %v774_v61 }
 0x43e   :  { %272 = vst.msk [vmem:[#allocation2] sm:$0xff] %vm271_vm15, %v269_v52 }
 0x43f   :  { %800 = vmatpush.msrb.mxu3 %v773_v9 }
 0x441   :  { %801 = vmatpush.msrb.mxu3 %v772_v10 }
 0x442   :  { %v574_v58 = vpop.permute.xlu1 %573 }
 0x443   :  { %594 = vmatpush.msrb.mxu1 %v574_v58 }
 0x444   :  { %850 = vmatmul.msk.f32.vlgmr.msrb.gmra.mxu1 %vm112_vm1, %v572_v59 }
 0x445   :  { %760 = vmatpush.msra.mxu1 %v740_v62 }
 0x44a   :  { %v353_v1 = vpop.permute.xlu1 %352 }
 0x44b   :  { %356 = vst.msk [vmem:[#allocation2] sm:$0xff] %vm355_vm7, %v353_v1 }
 0x44c   :  { %856 = vmatmul.msk.f32.vlgmr.msra.gmra.mxu1 %vm112_vm1, %v738_v2 }
 0x4ab   :  { %v432_v3 = vpop.f32.mrf.mxu1 }
 0x4ac   :  { %436 = vrot.lane.b32.xlu2 %v432_v3, %s1031_s20 }
 0x4ad   :  { %v517_v56 = vpop.f32.mrf.mxu0 }
 0x4ae   :  { %520 = vst.msk [vmem:[#allocation2 + $0x8] sm:$0xff] %vm112_vm1, %v517_v56 }
 0x4b5   :  { %v679_v4 = vpop.f32.mrf.mxu0 }
 0x4b6   :  { %683 = vrot.lane.b32.xlu1 %v679_v4, %s1030_s19 }
 0x4c1   :  { %v596_v5 = vpop.f32.mrf.mxu1 }
 0x4c2   :  { %600 = vrot.lane.b32.xlu0 %v596_v5, %s1016_s27 }
 0x4c9   :  { %v762_v6 = vpop.f32.mrf.mxu1 }
 0x4ca   :  { %766 = vrot.lane.b32.xlu2 %v762_v6, %s1031_s20 }
 0x506   :  { %v437_v22 = vpop.permute.xlu2 %436 }
 0x507   :  { %440 = vst.msk [vmem:[#allocation2] sm:$0xff] %vm439_vm8, %v437_v22 }
 0x50e   :  { %v770_v11 = vld [vmem:[#allocation2] sm:$0xff] }
 0x50f   :  { %857 = vmatmul.msk.f32.vlgmr.msrb.gmra.mxu3 %vm78_vm0, %v770_v11 }
 0x524   :  { %v767_v14 = vpop.permute.xlu2 %766 }
 0x528   :  { %v684_v13 = vpop.permute.xlu1 %683 }
 0x534   :  { %v601_v12 = vpop.permute.xlu0 %600 }
 0x535   :  { %603 = vst.msk [vmem:[#allocation2 + $0x8] sm:$0xff] %vm271_vm15, %v601_v12 }
 0x536   :  { %686 = vst.msk [vmem:[#allocation2 + $0x8] sm:$0xff] %vm355_vm7, %v684_v13 }
 0x537   :  { %769 = vst.msk [vmem:[#allocation2 + $0x8] sm:$0xff] %vm439_vm8, %v767_v14 }
 0x53e   :  { %v771_v15 = vld [vmem:[#allocation2 + $0x8] sm:$0xff] }
 0x53f   :  { %858 = vmatmul.msk.f32.gmra.mxu3 %vm78_vm0, %v771_v15 }
 0x592   :  { %v803_v17 = vpop.f32.mrf.mxu3 }
 0x593   :  { %v804_v18 = vadd.f32 %v879_v16, %v803_v17 }
 0x595   :  { %809 = vst.msk [vmem:[#allocation9] sm:$0xff] %vm78_vm0, %v804_v18 }
 0x5c2   :  { %v806_v19 = vpop.f32.mrf.mxu3 }
 0x5c3   :  { %v807_v20 = vadd.f32 %v879_v16, %v806_v19 }
 0x5c5   :  { %810 = vst.msk [vmem:[#allocation9 + $0x8] sm:$0xff] %vm78_vm0, %v807_v20 }
 0x5c6   :  { %823 = dma.vmem_to_hbm [thread:$0]  %s816_s24, 256, %s818_s29, [#allocation5], %s1015_s26, %s1015_s26, %s1016_s27  }
 0x5c7   :  { %1012 = dma.done.wait [#allocation5], 256  }
 0x5c8   :  { %1013 = vsyncadd [#allocation5], 4294967040 }
 0x5c9   :  { %828 = vsyncpa [#allocation4], 1 }
 0x5ca   :  { %829 = vsyncpa [#allocation7], 1 }
 0x5cb   :  { %830 = vsyncpa [#allocation5], 1 }

</bundles_post_ra>
